<compile_context>
chip_gen: v5e
topology: v5e:2x2
jax: 0.10.0
libtpu: 0.0.40
codegen_flags: <defaults>
</compile_context>

<pallas_src>
import jax
import jax.numpy as jnp
from jax.experimental import pallas as pl
from jax.experimental.pallas import tpu as pltpu

Z_DIM = 1
H1 = 32
H2 = 256
OUT = 784          # 28 * 28
OUT_PAD = 896      # 7 * 128 -> lane-dense output stores


def _round_up(x, m):
    return ((x + m - 1) // m) * m


def _decoder_kernel(z_ref, w1_ref, b1_ref, w2_ref, b2_ref, w3_ref, b3_ref,
                    o_ref):
    """One batch tile of the fused 3-layer MLP.

    z_ref: (TILE_B, Z_DIM) f32      w1: (Z_DIM, H1) f32   b1: (1, H1) f32
    w2: (H1, H2) bf16               b2: (1, H2) f32
    w3: (H2, OUT_PAD) bf16          b3: (1, OUT_PAD) f32
    o_ref: (TILE_B, OUT_PAD) f32
    """
    z = z_ref[...].astype(jnp.float32)                       # (TILE_B, Z_DIM)

    # Layer 1: Linear(z_dim -> 32) + ReLU.  K == 1 -> VPU outer product.
    if Z_DIM == 1:
        h1 = z * w1_ref[...]                                  # (TILE_B,1)*(1,H1)
    else:
        h1 = jnp.dot(z, w1_ref[...], preferred_element_type=jnp.float32)
    h1 = jnp.maximum(h1 + b1_ref[...], 0.0)                   # (TILE_B, H1)

    # Layer 2: Linear(32 -> 256) + ReLU on the MXU (bf16 in, f32 accumulate).
    h2 = jnp.dot(h1.astype(jnp.bfloat16), w2_ref[...],
                 preferred_element_type=jnp.float32)
    h2 = jnp.maximum(h2 + b2_ref[...], 0.0)                   # (TILE_B, H2)

    # Layer 3: Linear(256 -> 784(+pad)) + Sigmoid on the MXU.
    h3 = jnp.dot(h2.astype(jnp.bfloat16), w3_ref[...],
                 preferred_element_type=jnp.float32)
    h3 = h3 + b3_ref[...]                                     # (TILE_B, OUT_PAD)
    o_ref[...] = jax.nn.sigmoid(h3).astype(o_ref.dtype)


def decoder_forward(z, params, tile_b=256):
    """z: (B, Z_DIM) float32 -> (B, 1, 28, 28) float32."""
    w1, b1, w2, b2, w3, b3 = params
    B = z.shape[0]

    # Lane-pad the output weights/bias 784 -> 896 with zeros (sliced off later).
    w3p = jnp.zeros((H2, OUT_PAD), jnp.float32).at[:, :OUT].set(w3)
    b3p = jnp.zeros((1, OUT_PAD), jnp.float32).at[:, :OUT].set(b3)

    # bf16 operands for the MXU matmuls (accumulation stays f32).
    w2b = w2.astype(jnp.bfloat16)
    w3b = w3p.astype(jnp.bfloat16)

    # Batch tiling: TILE_B multiple of 8, pad B up to a multiple of TILE_B.
    TILE_B = min(tile_b, _round_up(B, 8))
    TILE_B = _round_up(TILE_B, 8)
    Bp = _round_up(B, TILE_B)
    if Bp != B:
        z = jnp.pad(z, ((0, Bp - B), (0, 0)))
    grid = (pl.cdiv(Bp, TILE_B),)

    weight_bytes = (w1.size + b1.size + b2.size + b3p.size) * 4 \
        + (w2b.size + w3b.size) * 2
    cost = pl.CostEstimate(
        flops=2 * Bp * (Z_DIM * H1 + H1 * H2 + H2 * OUT_PAD),
        transcendentals=Bp * OUT_PAD,
        bytes_accessed=Bp * Z_DIM * 4 + Bp * OUT_PAD * 4 + weight_bytes,
    )

    flat = pl.pallas_call(
        _decoder_kernel,
        out_shape=jax.ShapeDtypeStruct((Bp, OUT_PAD), jnp.float32),
        grid=grid,
        in_specs=[
            pl.BlockSpec((TILE_B, Z_DIM), lambda i: (i, 0)),   # z tile
            pl.BlockSpec((Z_DIM, H1), lambda i: (0, 0)),       # w1 (resident)
            pl.BlockSpec((1, H1), lambda i: (0, 0)),           # b1
            pl.BlockSpec((H1, H2), lambda i: (0, 0)),          # w2
            pl.BlockSpec((1, H2), lambda i: (0, 0)),           # b2
            pl.BlockSpec((H2, OUT_PAD), lambda i: (0, 0)),     # w3
            pl.BlockSpec((1, OUT_PAD), lambda i: (0, 0)),      # b3
        ],
        out_specs=pl.BlockSpec((TILE_B, OUT_PAD), lambda i: (i, 0)),
        compiler_params=pltpu.CompilerParams(
            dimension_semantics=("parallel",)),
        cost_estimate=cost,
    )(z, w1, b1, w2b, b2, w3b, b3p)

    # Drop batch/feature padding; NCHW view like torch's x.view(B, 1, 28, 28).
    return flat[:B, :OUT].reshape(B, 1, 28, 28)


def init_params(key):
    """Deterministic init mimicking nn.Linear (weights stored transposed:
    (in_features, out_features))."""
    keys = jax.random.split(key, 6)

    def lin(kw, kb, fan_in, fan_out):
        bound = 1.0 / jnp.sqrt(fan_in)
        w = jax.random.uniform(kw, (fan_in, fan_out), jnp.float32, -bound, bound)
        b = jax.random.uniform(kb, (1, fan_out), jnp.float32, -bound, bound)
        return w, b

    w1, b1 = lin(keys[0], keys[1], Z_DIM, H1)
    w2, b2 = lin(keys[2], keys[3], H1, H2)
    w3, b3 = lin(keys[4], keys[5], H2, OUT)
    return (w1, b1, w2, b2, w3, b3)


def _reference_forward(z, params):
    """Pure-JAX f32 reference for a correctness check."""
    w1, b1, w2, b2, w3, b3 = params
    h = jnp.maximum(z @ w1 + b1, 0.0)
    h = jnp.maximum(h @ w2 + b2, 0.0)
    h = jax.nn.sigmoid(h @ w3 + b3)
    return h.reshape(z.shape[0], 1, 28, 28)


if __name__ == "__main__":
    key = jax.random.PRNGKey(0)
    k_params, k_z = jax.random.split(key)

    params = init_params(k_params)
    B = 2
    z = jax.random.normal(k_z, (B, Z_DIM), dtype=jnp.float32)

    out = decoder_forward(z, params)
    out = jax.block_until_ready(out)

    assert out.shape == (B, 1, 28, 28), out.shape

    # bf16 MXU operands -> relaxed tolerance vs the f32 reference (sigmoid
    # outputs in [0,1]; observed error is well under 1e-2).
    ref = _reference_forward(z, params)
    max_err = float(jnp.max(jnp.abs(out - ref)))
    assert max_err < 2e-2, max_err

    print("KERNEL_OK")
</pallas_src>

<mosaic_0001>
module attributes {stable_mosaic.version = 11 : i64} {
  func.func @_decoder_kernel(%arg0: i32, %arg1: memref<8x1xf32, #tpu.memory_space<vmem>>, %arg2: memref<1x32xf32, #tpu.memory_space<vmem>>, %arg3: memref<1x32xf32, #tpu.memory_space<vmem>>, %arg4: memref<32x256xbf16, #tpu.memory_space<vmem>>, %arg5: memref<1x256xf32, #tpu.memory_space<vmem>>, %arg6: memref<256x896xbf16, #tpu.memory_space<vmem>>, %arg7: memref<1x896xf32, #tpu.memory_space<vmem>>, %arg8: memref<8x896xf32, #tpu.memory_space<vmem>>) attributes {dimension_semantics = [#tpu.dimension_semantics<parallel>], iteration_bounds = array<i64: 1>, scalar_prefetch = 0 : i64, scratch_operands = 0 : i64, tpu.core_type = #tpu.core_type<tc>, window_params = [{transform_indices = @transform_0, window_bounds = array<i64: 8, 1>}, {pipeline_mode = #tpu.pipeline_mode<synchronous>, transform_indices = @transform_1, window_bounds = array<i64: 1, 32>}, {pipeline_mode = #tpu.pipeline_mode<synchronous>, transform_indices = @transform_2, window_bounds = array<i64: 1, 32>}, {pipeline_mode = #tpu.pipeline_mode<synchronous>, transform_indices = @transform_3, window_bounds = array<i64: 32, 256>}, {pipeline_mode = #tpu.pipeline_mode<synchronous>, transform_indices = @transform_4, window_bounds = array<i64: 1, 256>}, {pipeline_mode = #tpu.pipeline_mode<synchronous>, transform_indices = @transform_5, window_bounds = array<i64: 256, 896>}, {pipeline_mode = #tpu.pipeline_mode<synchronous>, transform_indices = @transform_6, window_bounds = array<i64: 1, 896>}, {transform_indices = @transform_7, window_bounds = array<i64: 8, 896>}]} {
    %c0 = arith.constant 0 : index
    %c0_0 = arith.constant 0 : index
    %0 = vector.load %arg1[%c0, %c0_0] : memref<8x1xf32, #tpu.memory_space<vmem>>, vector<8x1xf32>
    %c0_1 = arith.constant 0 : index
    %c0_2 = arith.constant 0 : index
    %1 = vector.load %arg2[%c0_1, %c0_2] : memref<1x32xf32, #tpu.memory_space<vmem>>, vector<1x32xf32>
    %2 = vector.broadcast %0 : vector<8x1xf32> to vector<8x32xf32>
    %3 = vector.broadcast %1 : vector<1x32xf32> to vector<8x32xf32>
    %4 = arith.mulf %2, %3 : vector<8x32xf32>
    %c0_3 = arith.constant 0 : index
    %c0_4 = arith.constant 0 : index
    %5 = vector.load %arg3[%c0_3, %c0_4] : memref<1x32xf32, #tpu.memory_space<vmem>>, vector<1x32xf32>
    %6 = vector.broadcast %5 : vector<1x32xf32> to vector<8x32xf32>
    %7 = arith.addf %4, %6 : vector<8x32xf32>
    %cst = arith.constant 0.000000e+00 : f32
    %8 = vector.broadcast %cst : f32 to vector<8x32xf32>
    %9 = arith.maximumf %7, %8 : vector<8x32xf32>
    %10 = arith.truncf %9 : vector<8x32xf32> to vector<8x32xbf16>
    %c0_5 = arith.constant 0 : index
    %c0_6 = arith.constant 0 : index
    %11 = vector.load %arg4[%c0_5, %c0_6] : memref<32x256xbf16, #tpu.memory_space<vmem>>, vector<32x256xbf16>
    %cst_7 = arith.constant dense<0.000000e+00> : vector<8x256xf32>
    %12 = tpu.matmul %10, %11, %cst_7 {dimension_numbers = #tpu.dot_dimension_numbers<[1], [0], [0], [1], [0, 0, 1, 1], [], []>} : vector<8x32xbf16>, vector<32x256xbf16>, vector<8x256xf32> -> vector<8x256xf32>
    %c0_8 = arith.constant 0 : index
    %c0_9 = arith.constant 0 : index
    %13 = vector.load %arg5[%c0_8, %c0_9] : memref<1x256xf32, #tpu.memory_space<vmem>>, vector<1x256xf32>
    %14 = vector.broadcast %13 : vector<1x256xf32> to vector<8x256xf32>
    %15 = arith.addf %12, %14 : vector<8x256xf32>
    %cst_10 = arith.constant 0.000000e+00 : f32
    %16 = vector.broadcast %cst_10 : f32 to vector<8x256xf32>
    %17 = arith.maximumf %15, %16 : vector<8x256xf32>
    %18 = arith.truncf %17 : vector<8x256xf32> to vector<8x256xbf16>
    %c0_11 = arith.constant 0 : index
    %c0_12 = arith.constant 0 : index
    %19 = vector.load %arg6[%c0_11, %c0_12] : memref<256x896xbf16, #tpu.memory_space<vmem>>, vector<256x896xbf16>
    %cst_13 = arith.constant dense<0.000000e+00> : vector<8x896xf32>
    %20 = tpu.matmul %18, %19, %cst_13 {dimension_numbers = #tpu.dot_dimension_numbers<[1], [0], [0], [1], [0, 0, 1, 1], [], []>} : vector<8x256xbf16>, vector<256x896xbf16>, vector<8x896xf32> -> vector<8x896xf32>
    %c0_14 = arith.constant 0 : index
    %c0_15 = arith.constant 0 : index
    %21 = vector.load %arg7[%c0_14, %c0_15] : memref<1x896xf32, #tpu.memory_space<vmem>>, vector<1x896xf32>
    %22 = vector.broadcast %21 : vector<1x896xf32> to vector<8x896xf32>
    %23 = arith.addf %20, %22 : vector<8x896xf32>
    %24 = arith.negf %23 : vector<8x896xf32>
    %25 = math.exp %24 : vector<8x896xf32>
    %cst_16 = arith.constant 1.000000e+00 : f32
    %26 = vector.broadcast %cst_16 : f32 to vector<8x896xf32>
    %27 = arith.addf %26, %25 : vector<8x896xf32>
    %28 = arith.divf %26, %27 : vector<8x896xf32>
    %c0_17 = arith.constant 0 : index
    %c0_18 = arith.constant 0 : index
    %29 = vector.load %arg8[%c0_17, %c0_18] : memref<8x896xf32, #tpu.memory_space<vmem>>, vector<8x896xf32>
    tpu.vector_store %arg8[%c0_17, %c0_18], %28 {strides = array<i32>} : memref<8x896xf32, #tpu.memory_space<vmem>>, vector<8x896xf32>,
    return
  }
  func.func @transform_0(%arg0: i32) -> (i32, i32) {
    %c0_i32 = arith.constant 0 : i32
    %c0_i32_0 = arith.constant 0 : i32
    return %arg0, %c0_i32 : i32, i32
  }
  func.func @transform_1(%arg0: i32) -> (i32, i32) {
    %c0_i32 = arith.constant 0 : i32
    %c0_i32_0 = arith.constant 0 : i32
    %c0_i32_1 = arith.constant 0 : i32
    return %c0_i32, %c0_i32_0 : i32, i32
  }
  func.func @transform_2(%arg0: i32) -> (i32, i32) {
    %c0_i32 = arith.constant 0 : i32
    %c0_i32_0 = arith.constant 0 : i32
    %c0_i32_1 = arith.constant 0 : i32
    return %c0_i32, %c0_i32_0 : i32, i32
  }
  func.func @transform_3(%arg0: i32) -> (i32, i32) {
    %c0_i32 = arith.constant 0 : i32
    %c0_i32_0 = arith.constant 0 : i32
    %c0_i32_1 = arith.constant 0 : i32
    return %c0_i32, %c0_i32_0 : i32, i32
  }
  func.func @transform_4(%arg0: i32) -> (i32, i32) {
    %c0_i32 = arith.constant 0 : i32
    %c0_i32_0 = arith.constant 0 : i32
    %c0_i32_1 = arith.constant 0 : i32
    return %c0_i32, %c0_i32_0 : i32, i32
  }
  func.func @transform_5(%arg0: i32) -> (i32, i32) {
    %c0_i32 = arith.constant 0 : i32
    %c0_i32_0 = arith.constant 0 : i32
    %c0_i32_1 = arith.constant 0 : i32
    return %c0_i32, %c0_i32_0 : i32, i32
  }
  func.func @transform_6(%arg0: i32) -> (i32, i32) {
    %c0_i32 = arith.constant 0 : i32
    %c0_i32_0 = arith.constant 0 : i32
    %c0_i32_1 = arith.constant 0 : i32
    return %c0_i32, %c0_i32_0 : i32, i32
  }
  func.func @transform_7(%arg0: i32) -> (i32, i32) {
    %c0_i32 = arith.constant 0 : i32
    %c0_i32_0 = arith.constant 0 : i32
    return %arg0, %c0_i32 : i32, i32
  }
}

</mosaic_0001>

<bundles_post_ra>
// kernel: tpu_custom_call.1
= control target key start
LH: loop header
LB: loop body
LE: loop exit
PB: predicated region body
PF: predicated region fallthrough
CT: control target
= control target key end

     0   :  { %12 = vsyncpa [#allocation3], 0  ;;  %s2009_s0 = inlined_call_operand.vmem [shape: f32[8,1], index: 0, kind: input, shape index: {}]   ;;  %s2010_s1 = inlined_call_operand.vmem [shape: f32[1,32], index: 1, kind: input, shape index: {}]   ;;  %s2011_s2 = inlined_call_operand.vmem [shape: f32[1,32], index: 2, kind: input, shape index: {}]   ;;  %s2012_s3 = inlined_call_operand.hbm [shape: bf16[32,256], index: 3, kind: input, shape index: {}]   ;;  %s2013_s4 = inlined_call_operand.vmem [shape: f32[1,256], index: 4, kind: input, shape index: {}]   ;;  %s2014_s5 = inlined_call_operand.hbm [shape: bf16[256,896], index: 5, kind: input, shape index: {}]   ;;  %s2015_s6 = inlined_call_operand.vmem [shape: f32[1,896], index: 6, kind: input, shape index: {}]   ;;  %s2016_s7 = inlined_call_operand.hbm [shape: f32[8,896], index: 7, kind: output, shape index: {}]  }
   0x1   :  { %13 = vsyncpa [#allocation6], 0 }
   0x2   :  { %14 = vsyncpa [#allocation4], 0  ;;  %s25_s26 = sshll.u32 %s2012_s3, 4  ;;  %s1908_s27 = smov [#allocation2]   ;;  %s26_s26 = int_to_ptr.hbm [resolvable:$true] %s25_s26 }
   0x3   :  { %s27_s28 = sshll.u32 %s1908_s27, 4  ;;  %s40_s8 = sshll.u32 %s2014_s5, 4  ;;  %s28_s28 = int_to_ptr.vmem [resolvable:$true] %s27_s28  ;;  %s41_s8 = int_to_ptr.hbm [resolvable:$true] %s40_s8 }
   0x4   :  { %s1909_s9 = smov 128   ;;  %s1910_s10 = smov 8  }
   0x5   :  { %33 = dma.hbm_to_vmem [thread:$0]  %s26_s26, 512, %s28_s28, [#allocation3], %s1909_s9, %s1909_s9, %s1910_s10  }
   0x6   :  { %s1911_s11 = smov [#allocation5]   ;;  %s1912_s13 = smov 448  }
   0x7   :  { %s42_s12 = sshll.u32 %s1911_s11, 4  ;;  %s1913_s14 = smov 28   ;;  %s43_s12 = int_to_ptr.vmem [resolvable:$true] %s42_s12 }
   0x8   :  { %48 = dma.hbm_to_vmem [thread:$0]  %s41_s8, 14336, %s43_s12, [#allocation6], %s1912_s13, %s1912_s13, %s1913_s14  }
   0x9   :  { %1902 = dma.done.wait [#allocation3], 512  }
   0xa   :  { %1903 = vsyncadd [#allocation3], 4294966784 }
   0xb   :  { %1904 = dma.done.wait [#allocation6], 14336  }
   0xc   :  { %1905 = vsyncadd [#allocation6], 4294952960  ;;  %v1914_v0 = vmov 0   ;;  %v60_v1 = vld [vmem:[%s2009_s0] sm:$0xff]  ;;  %v1212_v2 = vld [vmem:[#allocation2 + $0x10] sm:$0xf] }
   0xd   :  { %1799 = vset.pattern.permute.xlu0 %v1914_v0  ;;  %v1678_v3 = vld [vmem:[#allocation2 + $0x14] sm:$0xf0]  ;;  %v1677_v4 = vld [vmem:[#allocation2 + $0x14] sm:$0xf]  ;;  %v1214_v6 = vld [vmem:[#allocation2 + $0x18] sm:$0xf0] }
   0xe   :  { %64 = vperm.xlu0 %1799, %v60_v1   ;;  %v1213_v5 = vor.u32 %v1678_v3, %v1212_v2  ;;  %v1217_v7 = vor.u32 %v1677_v4, %v1214_v6  ;;  %v1204_v8 = vld [vmem:[#allocation2] sm:$0xf]  ;;  %v1676_v9 = vld [vmem:[#allocation2 + $0x4] sm:$0xf0]  ;;  %v1675_v10 = vld [vmem:[#allocation2 + $0x4] sm:$0xf] }
   0xf   :  { %v1205_v11 = vor.u32 %v1676_v9, %v1204_v8  ;;  %v1206_v12 = vld [vmem:[#allocation2 + $0x8] sm:$0xf0]  ;;  %v1418_v14 = vld [vmem:[#allocation5 + $0x188] sm:$0xf]  ;;  %v1731_v15 = vld [vmem:[#allocation5 + $0x1a0] sm:$0xf0] }
  0x10   :  { %118 = vmatpush.bf16.msra.mxu0 %v1213_v5  ;;  %131 = vmatpush.bf16.msra.mxu1 %v1217_v7  ;;  %v1209_v13 = vor.u32 %v1675_v10, %v1206_v12  ;;  %v1642_v16 = vld [vmem:[#allocation5 + $0x348] sm:$0xf]  ;;  %v1419_v17 = vor.u32 %v1731_v15, %v1418_v14  ;;  %v1787_v18 = vld [vmem:[#allocation5 + $0x360] sm:$0xf0]  ;;  %v1728_v19 = vld [vmem:[#allocation5 + $0x18c] sm:$0xf] }
  0x11   :  { %v1420_v20 = vld [vmem:[#allocation5 + $0x1a4] sm:$0xf0]  ;;  %v1643_v21 = vor.u32 %v1787_v18, %v1642_v16  ;;  %v1784_v23 = vld [vmem:[#allocation5 + $0x34c] sm:$0xf]  ;;  %v1390_v25 = vld [vmem:[#allocation5 + $0x150] sm:$0xf] }
  0x12   :  { %v1423_v22 = vor.u32 %v1728_v19, %v1420_v20  ;;  %v1644_v24 = vld [vmem:[#allocation5 + $0x364] sm:$0xf0]  ;;  %862 = vmatpush.bf16.msra.mxu2 %v1419_v17  ;;  %v1724_v27 = vld [vmem:[#allocation5 + $0x168] sm:$0xf0]  ;;  %v1614_v28 = vld [vmem:[#allocation5 + $0x310] sm:$0xf] }
  0x13   :  { %v1647_v26 = vor.u32 %v1784_v23, %v1644_v24  ;;  %v1780_v29 = vld [vmem:[#allocation5 + $0x328] sm:$0xf0]  ;;  %875 = vmatpush.bf16.msra.mxu3 %v1643_v21  ;;  %v1391_v30 = vor.u32 %v1724_v27, %v1390_v25  ;;  %v1721_v32 = vld [vmem:[#allocation5 + $0x154] sm:$0xf]  ;;  %v1392_v33 = vld [vmem:[#allocation5 + $0x16c] sm:$0xf0] }
  0x14   :  { %119 = vmatpush.bf16.msra.mxu0 %v1205_v11  ;;  %132 = vmatpush.bf16.msra.mxu1 %v1209_v13  ;;  %v1615_v31 = vor.u32 %v1780_v29, %v1614_v28  ;;  %v1777_v34 = vld [vmem:[#allocation5 + $0x314] sm:$0xf]  ;;  %v1395_v35 = vor.u32 %v1721_v32, %v1392_v33  ;;  %v1616_v36 = vld [vmem:[#allocation5 + $0x32c] sm:$0xf0]  ;;  %v1362_v37 = vld [vmem:[#allocation5 + $0x118] sm:$0xf] }
  0x15   :  { %v1717_v38 = vld [vmem:[#allocation5 + $0x130] sm:$0xf0]  ;;  %v1619_v39 = vor.u32 %v1777_v34, %v1616_v36  ;;  %v1586_v40 = vld [vmem:[#allocation5 + $0x2d8] sm:$0xf]  ;;  %v1714_v42 = vld [vmem:[#allocation5 + $0x11c] sm:$0xf] }
  0x16   :  { %v1773_v41 = vld [vmem:[#allocation5 + $0x2f0] sm:$0xf0]  ;;  %863 = vmatpush.bf16.msra.mxu2 %v1391_v30  ;;  %v1363_v43 = vor.u32 %v1717_v38, %v1362_v37  ;;  %v1364_v44 = vld [vmem:[#allocation5 + $0x134] sm:$0xf0]  ;;  %v1770_v45 = vld [vmem:[#allocation5 + $0x2dc] sm:$0xf] }
  0x17   :  { %v1588_v46 = vld [vmem:[#allocation5 + $0x2f4] sm:$0xf0]  ;;  %876 = vmatpush.bf16.msra.mxu3 %v1615_v31  ;;  %v1587_v47 = vor.u32 %v1773_v41, %v1586_v40  ;;  %v1367_v48 = vor.u32 %v1714_v42, %v1364_v44  ;;  %v1334_v49 = vld [vmem:[#allocation5 + $0xe0] sm:$0xf]  ;;  %v1710_v50 = vld [vmem:[#allocation5 + $0xf8] sm:$0xf0] }
  0x18   :  { %888 = vmatpush.bf16.msrb.mxu0 %v1423_v22  ;;  %901 = vmatpush.bf16.msrb.mxu1 %v1647_v26  ;;  %v1558_v51 = vld [vmem:[#allocation5 + $0x2a0] sm:$0xf]  ;;  %v1591_v52 = vor.u32 %v1770_v45, %v1588_v46  ;;  %v1766_v53 = vld [vmem:[#allocation5 + $0x2b8] sm:$0xf0]  ;;  %v1707_v54 = vld [vmem:[#allocation5 + $0xe4] sm:$0xf]  ;;  %v1335_v58 = vor.u32 %v1710_v50, %v1334_v49 }
  0x19   :  { %v1336_v55 = vld [vmem:[#allocation5 + $0xfc] sm:$0xf0]  ;;  %v1763_v56 = vld [vmem:[#allocation5 + $0x2a4] sm:$0xf]  ;;  %v1559_v59 = vor.u32 %v1766_v53, %v1558_v51  ;;  %v1306_v61 = vld [vmem:[#allocation5 + $0xa8] sm:$0xf] }
  0x1a   :  { %v1560_v57 = vld [vmem:[#allocation5 + $0x2bc] sm:$0xf0]  ;;  %864 = vmatpush.bf16.msra.mxu2 %v1363_v43  ;;  %v1339_v60 = vor.u32 %v1707_v54, %v1336_v55  ;;  %v1703_v62 = vld [vmem:[#allocation5 + $0xc0] sm:$0xf0]  ;;  %v1530_v63 = vld [vmem:[#allocation5 + $0x268] sm:$0xf] }
  0x1b   :  { %877 = vmatpush.bf16.msra.mxu3 %v1587_v47  ;;  %v1563_v0 = vor.u32 %v1763_v56, %v1560_v57  ;;  %v1759_v1 = vld [vmem:[#allocation5 + $0x280] sm:$0xf0]  ;;  %v1700_v2 = vld [vmem:[#allocation5 + $0xac] sm:$0xf]  ;;  %v1308_v3 = vld [vmem:[#allocation5 + $0xc4] sm:$0xf0]  ;;  %v1307_v6 = vor.u32 %v1703_v62, %v1306_v61 }
  0x1c   :  { %889 = vmatpush.bf16.msrb.mxu0 %v1395_v35  ;;  %902 = vmatpush.bf16.msrb.mxu1 %v1619_v39  ;;  %v1756_v4 = vld [vmem:[#allocation5 + $0x26c] sm:$0xf]  ;;  %v1532_v5 = vld [vmem:[#allocation5 + $0x284] sm:$0xf0]  ;;  %v1531_v7 = vor.u32 %v1759_v1, %v1530_v63  ;;  %v1311_v8 = vor.u32 %v1700_v2, %v1308_v3  ;;  %v1278_v9 = vld [vmem:[#allocation5 + $0x70] sm:$0xf] }
  0x1d   :  { %v1696_v10 = vld [vmem:[#allocation5 + $0x88] sm:$0xf0]  ;;  %v1502_v11 = vld [vmem:[#allocation5 + $0x230] sm:$0xf]  ;;  %v1535_v12 = vor.u32 %v1756_v4, %v1532_v5  ;;  %v1693_v14 = vld [vmem:[#allocation5 + $0x74] sm:$0xf] }
  0x1e   :  { %865 = vmatpush.bf16.msra.mxu2 %v1335_v58  ;;  %v1752_v13 = vld [vmem:[#allocation5 + $0x248] sm:$0xf0]  ;;  %v1280_v15 = vld [vmem:[#allocation5 + $0x8c] sm:$0xf0]  ;;  %v1749_v16 = vld [vmem:[#allocation5 + $0x234] sm:$0xf]  ;;  %v1279_v19 = vor.u32 %v1696_v10, %v1278_v9 }
  0x1f   :  { %878 = vmatpush.bf16.msra.mxu3 %v1559_v59  ;;  %v1504_v17 = vld [vmem:[#allocation5 + $0x24c] sm:$0xf0]  ;;  %v1800_v18 = vld [vmem:[%s2010_s1] ss:$0 sm:$0xff]  ;;  %v1503_v20 = vor.u32 %v1752_v13, %v1502_v11  ;;  %v1283_v21 = vor.u32 %v1693_v14, %v1280_v15  ;;  %v1250_v22 = vld [vmem:[#allocation5 + $0x38] sm:$0xf] }
  0x20   :  { %890 = vmatpush.bf16.msrb.mxu0 %v1367_v48  ;;  %903 = vmatpush.bf16.msrb.mxu1 %v1591_v52  ;;  %v1689_v23 = vld [vmem:[#allocation5 + $0x50] sm:$0xf0]  ;;  %v1474_v24 = vld [vmem:[#allocation5 + $0x1f8] sm:$0xf]  ;;  %v1507_v25 = vor.u32 %v1749_v16, %v1504_v17  ;;  %v1686_v27 = vld [vmem:[#allocation5 + $0x3c] sm:$0xf] }
  0x21   :  { %v1745_v26 = vld [vmem:[#allocation5 + $0x210] sm:$0xf0]  ;;  %v1252_v28 = vld [vmem:[#allocation5 + $0x54] sm:$0xf0]  ;;  %v1801_v29 = vld [vmem:[%s2011_s2] ss:$0 sm:$0xff]  ;;  %v1251_v33 = vor.u32 %v1689_v23, %v1250_v22 }
  0x22   :  { %866 = vmatpush.bf16.msra.mxu2 %v1307_v6  ;;  %v1742_v30 = vld [vmem:[#allocation5 + $0x1fc] sm:$0xf]  ;;  %v1476_v31 = vld [vmem:[#allocation5 + $0x214] sm:$0xf0]  ;;  %v1475_v35 = vor.u32 %v1745_v26, %v1474_v24  ;;  %v1255_v36 = vor.u32 %v1686_v27, %v1252_v28  ;;  %v1222_v37 = vld [vmem:[#allocation5] sm:$0xf] }
  0x23   :  { %879 = vmatpush.bf16.msra.mxu3 %v1531_v7  ;;  %v1682_v38 = vld [vmem:[#allocation5 + $0x18] sm:$0xf0]  ;;  %v1446_v39 = vld [vmem:[#allocation5 + $0x1c0] sm:$0xf]  ;;  %v1479_v40 = vor.u32 %v1742_v30, %v1476_v31  ;;  %v1679_v42 = vld [vmem:[#allocation5 + $0x4] sm:$0xf] }
  0x24   :  { %891 = vmatpush.bf16.msrb.mxu0 %v1339_v60  ;;  %904 = vmatpush.bf16.msrb.mxu1 %v1563_v0  ;;  %v1738_v41 = vld [vmem:[#allocation5 + $0x1d8] sm:$0xf0]  ;;  %v1224_v43 = vld [vmem:[#allocation5 + $0x1c] sm:$0xf0]  ;;  %v1735_v45 = vld [vmem:[#allocation5 + $0x1c4] sm:$0xf]  ;;  %v1223_v48 = vor.u32 %v1682_v38, %v1222_v37 }
  0x25   :  { %v1448_v46 = vld [vmem:[#allocation5 + $0x1dc] sm:$0xf0]  ;;  %v1426_v47 = vld [vmem:[#allocation5 + $0x190] sm:$0xf]  ;;  %v1732_v49 = vld [vmem:[#allocation5 + $0x1a8] sm:$0xf0]  ;;  %v1447_v55 = vor.u32 %v1738_v41, %v1446_v39  ;;  %v1227_v56 = vor.u32 %v1679_v42, %v1224_v43 }
  0x26   :  { %867 = vmatpush.bf16.msra.mxu2 %v1279_v19  ;;  %v1650_v50 = vld [vmem:[#allocation5 + $0x350] sm:$0xf]  ;;  %v1788_v51 = vld [vmem:[#allocation5 + $0x368] sm:$0xf0]  ;;  %v1729_v53 = vld [vmem:[#allocation5 + $0x194] sm:$0xf]  ;;  %v1451_v60 = vor.u32 %v1735_v45, %v1448_v46  ;;  %v1427_v61 = vor.u32 %v1732_v49, %v1426_v47 }
  0x27   :  { %880 = vmatpush.bf16.msra.mxu3 %v1503_v20  ;;  %v1428_v54 = vld [vmem:[#allocation5 + $0x1ac] sm:$0xf0]  ;;  %vm108_vm0 = vcmask 261120   ;;  %v1785_v57 = vld [vmem:[#allocation5 + $0x354] sm:$0xf]  ;;  %v1651_v62 = vor.u32 %v1788_v51, %v1650_v50  ;;  %s1191_s22 = sshll.u32 %s2016_s7, 4  ;;  %s1192_s22 = int_to_ptr.hbm [resolvable:$true] %s1191_s22 }
  0x28   :  { %892 = vmatpush.bf16.msrb.mxu0 %v1311_v8  ;;  %905 = vmatpush.bf16.msrb.mxu1 %v1535_v12  ;;  %v1652_v58 = vld [vmem:[#allocation5 + $0x36c] sm:$0xf0]  ;;  %v1431_v63 = vor.u32 %v1729_v53, %v1428_v54  ;;  %v1398_v0 = vld [vmem:[#allocation5 + $0x158] sm:$0xf]  ;;  %v1725_v1 = vld [vmem:[#allocation5 + $0x170] sm:$0xf0] }
  0x29   :  { %v1622_v2 = vld [vmem:[#allocation5 + $0x318] sm:$0xf]  ;;  %v1655_v3 = vor.u32 %v1785_v57, %v1652_v58  ;;  %v1781_v4 = vld [vmem:[#allocation5 + $0x330] sm:$0xf0]  ;;  %v1722_v5 = vld [vmem:[#allocation5 + $0x15c] sm:$0xf]  ;;  %v1399_v9 = vor.u32 %v1725_v1, %v1398_v0 }
  0x2a   :  { %868 = vmatpush.bf16.msra.mxu2 %v1251_v33  ;;  %v1400_v6 = vld [vmem:[#allocation5 + $0x174] sm:$0xf0]  ;;  %v1778_v7 = vld [vmem:[#allocation5 + $0x31c] sm:$0xf]  ;;  %v1623_v10 = vor.u32 %v1781_v4, %v1622_v2  ;;  %v1370_v12 = vld [vmem:[#allocation5 + $0x120] sm:$0xf] }
  0x2b   :  { %881 = vmatpush.bf16.msra.mxu3 %v1475_v35  ;;  %v1624_v8 = vld [vmem:[#allocation5 + $0x334] sm:$0xf0]  ;;  %v1403_v11 = vor.u32 %v1722_v5, %v1400_v6  ;;  %v1718_v13 = vld [vmem:[#allocation5 + $0x138] sm:$0xf0]  ;;  %v1594_v14 = vld [vmem:[#allocation5 + $0x2e0] sm:$0xf] }
  0x2c   :  { %893 = vmatpush.bf16.msrb.mxu0 %v1283_v21  ;;  %906 = vmatpush.bf16.msrb.mxu1 %v1507_v25  ;;  %v1627_v15 = vor.u32 %v1778_v7, %v1624_v8  ;;  %v1774_v16 = vld [vmem:[#allocation5 + $0x2f8] sm:$0xf0]  ;;  %v1715_v17 = vld [vmem:[#allocation5 + $0x124] sm:$0xf]  ;;  %v1596_v20 = vld [vmem:[#allocation5 + $0x2fc] sm:$0xf0]  ;;  %v1371_v21 = vor.u32 %v1718_v13, %v1370_v12 }
  0x2d   :  { %v1771_v19 = vld [vmem:[#allocation5 + $0x2e4] sm:$0xf]  ;;  %v1595_v22 = vor.u32 %v1774_v16, %v1594_v14  ;;  %v1342_v24 = vld [vmem:[#allocation5 + $0xe8] sm:$0xf]  ;;  %v1764_v31 = vld [vmem:[#allocation5 + $0x2ac] sm:$0xf] }
  0x2e   :  { %869 = vmatpush.bf16.msra.mxu2 %v1223_v48  ;;  %v1711_v25 = vld [vmem:[#allocation5 + $0x100] sm:$0xf0]  ;;  %v1566_v26 = vld [vmem:[#allocation5 + $0x2a8] sm:$0xf]  ;;  %v1599_v27 = vor.u32 %v1771_v19, %v1596_v20  ;;  %v1704_v37 = vld [vmem:[#allocation5 + $0xc8] sm:$0xf0] }
  0x2f   :  { %882 = vmatpush.bf16.msra.mxu3 %v1447_v55  ;;  %v1767_v28 = vld [vmem:[#allocation5 + $0x2c0] sm:$0xf0]  ;;  %v1344_v30 = vld [vmem:[#allocation5 + $0x104] sm:$0xf0]  ;;  %v1343_v33 = vor.u32 %v1711_v25, %v1342_v24  ;;  %v1538_v38 = vld [vmem:[#allocation5 + $0x270] sm:$0xf] }
  0x30   :  { %894 = vmatpush.bf16.msrb.mxu0 %v1255_v36  ;;  %907 = vmatpush.bf16.msrb.mxu1 %v1479_v40  ;;  %v1314_v36 = vld [vmem:[#allocation5 + $0xb0] sm:$0xf]  ;;  %v1760_v40 = vld [vmem:[#allocation5 + $0x288] sm:$0xf0]  ;;  %v1701_v41 = vld [vmem:[#allocation5 + $0xb4] sm:$0xf] }
  0x31   :  { %v1316_v42 = vld [vmem:[#allocation5 + $0xcc] sm:$0xf0]  ;;  %v1757_v43 = vld [vmem:[#allocation5 + $0x274] sm:$0xf]  ;;  %v1315_v45 = vor.u32 %v1704_v37, %v1314_v36  ;;  %v1539_v46 = vor.u32 %v1760_v40, %v1538_v38  ;;  %v1286_v48 = vld [vmem:[#allocation5 + $0x78] sm:$0xf] }
  0x32   :  { %914 = vmatpush.bf16.msrb.mxu2 %v1427_v61  ;;  %v1319_v47 = vor.u32 %v1701_v41, %v1316_v42  ;;  %v1697_v49 = vld [vmem:[#allocation5 + $0x90] sm:$0xf0]  ;;  %v1510_v50 = vld [vmem:[#allocation5 + $0x238] sm:$0xf]  ;;  %v1694_v53 = vld [vmem:[#allocation5 + $0x7c] sm:$0xf] }
  0x33   :  { %927 = vmatpush.bf16.msrb.mxu3 %v1651_v62  ;;  %v1288_v54 = vld [vmem:[#allocation5 + $0x94] sm:$0xf0]  ;;  %v1750_v55 = vld [vmem:[#allocation5 + $0x23c] sm:$0xf]  ;;  %v1287_v57 = vor.u32 %v1697_v49, %v1286_v48  ;;  %v1258_v61 = vld [vmem:[#allocation5 + $0x40] sm:$0xf] }
  0x34   :  { %895 = vmatpush.bf16.msrb.mxu0 %v1227_v56  ;;  %908 = vmatpush.bf16.msrb.mxu1 %v1451_v60  ;;  %v1512_v56 = vld [vmem:[#allocation5 + $0x254] sm:$0xf0]  ;;  %v1690_v62 = vld [vmem:[#allocation5 + $0x58] sm:$0xf0]  ;;  %v1482_v0 = vld [vmem:[#allocation5 + $0x200] sm:$0xf] }
  0x35   :  { %v1515_v60 = vor.u32 %v1750_v55, %v1512_v56  ;;  %v1746_v1 = vld [vmem:[#allocation5 + $0x218] sm:$0xf0]  ;;  %v1687_v2 = vld [vmem:[#allocation5 + $0x44] sm:$0xf]  ;;  %v1260_v4 = vld [vmem:[#allocation5 + $0x5c] sm:$0xf0] }
  0x36   :  { %915 = vmatpush.bf16.msrb.mxu2 %v1399_v9  ;;  %v1743_v5 = vld [vmem:[#allocation5 + $0x204] sm:$0xf]  ;;  %v1484_v6 = vld [vmem:[#allocation5 + $0x21c] sm:$0xf0]  ;;  %v1263_v7 = vor.u32 %v1687_v2, %v1260_v4  ;;  %v1230_v9 = vld [vmem:[#allocation5 + $0x8] sm:$0xf] }
  0x37   :  { %928 = vmatpush.bf16.msrb.mxu3 %v1623_v10  ;;  %v1487_v8 = vor.u32 %v1743_v5, %v1484_v6  ;;  %v1683_v10 = vld [vmem:[#allocation5 + $0x20] sm:$0xf0]  ;;  %v1232_v16 = vld [vmem:[#allocation5 + $0x24] sm:$0xf0]  ;;  %v1786_v36 = vld [vmem:[#allocation5 + $0x35c] sm:$0xf] }
  0x38   :  { %v1231_v12 = vor.u32 %v1683_v10, %v1230_v9  ;;  %v1739_v13 = vld [vmem:[#allocation5 + $0x1e0] sm:$0xf0]  ;;  %v1456_v19 = vld [vmem:[#allocation5 + $0x1e4] sm:$0xf0]  ;;  %v1660_v37 = vld [vmem:[#allocation5 + $0x374] sm:$0xf0] }
  0x39   :  { %v1406_v42 = vld [vmem:[#allocation5 + $0x160] sm:$0xf]  ;;  %v1723_v48 = vld [vmem:[#allocation5 + $0x164] sm:$0xf]  ;;  %v1378_v56 = vld [vmem:[#allocation5 + $0x128] sm:$0xf] }
  0x3a   :  { %916 = vmatpush.bf16.msrb.mxu2 %v1371_v21  ;;  %v82_v21 = vld [vmem:[%s2013_s4] sm:$0x3]  ;;  %v1350_v4 = vld [vmem:[#allocation5 + $0xf0] sm:$0xf]  ;;  %v1712_v5 = vld [vmem:[#allocation5 + $0x108] sm:$0xf0] }
  0x3b   :  { %929 = vmatpush.bf16.msrb.mxu3 %v1595_v22  ;;  %v84_v22 = vperm.slane %v82_v21, 0  ;;  %v1408_v49 = vld [vmem:[#allocation5 + $0x17c] sm:$0xf0]  ;;  %v1768_v9 = vld [vmem:[#allocation5 + $0x2c8] sm:$0xf0] }
  0x3c   :  { %v1709_v10 = vld [vmem:[#allocation5 + $0xf4] sm:$0xf] }
  0x3e   :  { %917 = vmatpush.bf16.msrb.mxu2 %v1343_v33  ;;  %v1436_v33 = vld [vmem:[#allocation5 + $0x1b4] sm:$0xf0] }
  0x42   :  { %918 = vmatpush.bf16.msrb.mxu2 %v1315_v45  ;;  %v1663_v45 = vor.u32 %v1786_v36, %v1660_v37  ;;  %v1751_v36 = vld [vmem:[#allocation5 + $0x244] sm:$0xf]  ;;  %v1520_v37 = vld [vmem:[#allocation5 + $0x25c] sm:$0xf0] }
  0x46   :  { %919 = vmatpush.bf16.msrb.mxu2 %v1287_v57  ;;  %v1719_v57 = vld [vmem:[#allocation5 + $0x140] sm:$0xf0] }
  0x47   :  { %v1379_v2 = vor.u32 %v1719_v57, %v1378_v56  ;;  %v1462_v56 = vld [vmem:[#allocation5 + $0x1d0] sm:$0xf] }
  0x80   :  { %v65_v32 = vpop.permute.xlu0 %64 }
  0x81   :  { %v70_v34 = vmul.f32 %v1800_v18, %v65_v32  ;;  %v1372_v18 = vld [vmem:[#allocation5 + $0x13c] sm:$0xf0]  ;;  %v1568_v32 = vld [vmem:[#allocation5 + $0x2c4] sm:$0xf0] }
  0x82   :  { %v1375_v23 = vor.u32 %v1715_v17, %v1372_v18  ;;  %v1571_v39 = vor.u32 %v1764_v31, %v1568_v32  ;;  %v1736_v17 = vld [vmem:[#allocation5 + $0x1cc] sm:$0xf]  ;;  %v1789_v31 = vld [vmem:[#allocation5 + $0x370] sm:$0xf0]  ;;  %v1730_v32 = vld [vmem:[#allocation5 + $0x19c] sm:$0xf] }
  0x83   :  { %v75_v44 = vadd.f32 %v1801_v29, %v70_v34  ;;  %v1708_v29 = vld [vmem:[#allocation5 + $0xec] sm:$0xf]  ;;  %v1567_v34 = vor.u32 %v1767_v28, %v1566_v26  ;;  %v1459_v20 = vor.u32 %v1736_v17, %v1456_v19  ;;  %v1434_v28 = vld [vmem:[#allocation5 + $0x198] sm:$0xf]  ;;  %v1705_v17 = vld [vmem:[#allocation5 + $0xd0] sm:$0xf0] }
  0x84   :  { %v1347_v35 = vor.u32 %v1708_v29, %v1344_v30  ;;  %v1733_v29 = vld [vmem:[#allocation5 + $0x1b0] sm:$0xf0]  ;;  %v1658_v30 = vld [vmem:[#allocation5 + $0x358] sm:$0xf] }
  0x85   :  { %v76_v52 = vmax.f32 %v75_v44, 0.0  ;;  %v1540_v44 = vld [vmem:[#allocation5 + $0x28c] sm:$0xf0]  ;;  %930 = vmatpush.bf16.msrb.mxu3 %v1567_v34  ;;  %v1435_v40 = vor.u32 %v1733_v29, %v1434_v28  ;;  %v1659_v41 = vor.u32 %v1789_v31, %v1658_v30  ;;  %v1294_v28 = vld [vmem:[#allocation5 + $0x80] sm:$0xf] }
  0x86   :  { %v1543_v51 = vor.u32 %v1757_v43, %v1540_v44  ;;  %v1726_v43 = vld [vmem:[#allocation5 + $0x178] sm:$0xf0]  ;;  %v1439_v44 = vor.u32 %v1730_v32, %v1436_v33  ;;  %v1518_v32 = vld [vmem:[#allocation5 + $0x240] sm:$0xf] }
  0x87   :  { %v77_v59 = vpack.c.bf16 %v76_v52, %v76_v52  ;;  %v1753_v52 = vld [vmem:[#allocation5 + $0x250] sm:$0xf0]  ;;  %v1698_v29 = vld [vmem:[#allocation5 + $0x98] sm:$0xf0] }
  0x88   :  { %v1511_v58 = vor.u32 %v1753_v52, %v1510_v50  ;;  %v1779_v50 = vld [vmem:[#allocation5 + $0x324] sm:$0xf]  ;;  %v1754_v33 = vld [vmem:[#allocation5 + $0x258] sm:$0xf0] }
  0x89   :  { %1218 = vmatmul.msk.bf16.vlgmr.msra.gmra.mxu0 %vm108_vm0, %v77_v59  ;;  %1219 = vmatmul.msk.bf16.vlgmr.msra.gmra.mxu1 %vm108_vm0, %v77_v59  ;;  %v1291_v59 = vor.u32 %v1694_v53, %v1288_v54  ;;  %v1407_v54 = vor.u32 %v1726_v43, %v1406_v42  ;;  %v1266_v42 = vld [vmem:[#allocation5 + $0x48] sm:$0xf]  ;;  %v1691_v43 = vld [vmem:[#allocation5 + $0x60] sm:$0xf0] }
  0x8a   :  { %940 = vmatpush.bf16.msra.mxu0 %v1431_v63  ;;  %953 = vmatpush.bf16.msra.mxu1 %v1655_v3  ;;  %v1259_v63 = vor.u32 %v1690_v62, %v1258_v61  ;;  %v1483_v3 = vor.u32 %v1746_v1, %v1482_v0  ;;  %v1775_v61 = vld [vmem:[#allocation5 + $0x300] sm:$0xf0]  ;;  %v1716_v62 = vld [vmem:[#allocation5 + $0x12c] sm:$0xf]  ;;  %v1604_v1 = vld [vmem:[#allocation5 + $0x304] sm:$0xf0] }
  0x8b   :  { %931 = vmatpush.bf16.msrb.mxu3 %v1539_v46  ;;  %v1630_v46 = vld [vmem:[#allocation5 + $0x320] sm:$0xf]  ;;  %v1772_v0 = vld [vmem:[#allocation5 + $0x2ec] sm:$0xf] }
  0x8c   :  { %920 = vmatpush.bf16.msrb.mxu2 %v1259_v63  ;;  %v1380_v63 = vld [vmem:[#allocation5 + $0x144] sm:$0xf0] }
  0x8d   :  { %v1383_v6 = vor.u32 %v1716_v62, %v1380_v63  ;;  %v1737_v62 = vld [vmem:[#allocation5 + $0x1d4] sm:$0xf]  ;;  %v1464_v63 = vld [vmem:[#allocation5 + $0x1ec] sm:$0xf0] }
  0x8e   :  { %941 = vmatpush.bf16.msra.mxu0 %v1403_v11  ;;  %954 = vmatpush.bf16.msra.mxu1 %v1627_v15  ;;  %v1454_v11 = vld [vmem:[#allocation5 + $0x1c8] sm:$0xf]  ;;  %v1680_v15 = vld [vmem:[#allocation5 + $0xc] sm:$0xf] }
  0x8f   :  { %932 = vmatpush.bf16.msrb.mxu3 %v1511_v58  ;;  %v1455_v14 = vor.u32 %v1739_v13, %v1454_v11  ;;  %v1235_v18 = vor.u32 %v1680_v15, %v1232_v16  ;;  %v1411_v58 = vor.u32 %v1723_v48, %v1408_v49  ;;  %v1352_v11 = vld [vmem:[#allocation5 + $0x10c] sm:$0xf0]  ;;  %v1322_v16 = vld [vmem:[#allocation5 + $0xb8] sm:$0xf]  ;;  %v1688_v48 = vld [vmem:[#allocation5 + $0x4c] sm:$0xf] }
  0x90   :  { %921 = vmatpush.bf16.msrb.mxu2 %v1231_v12  ;;  %v1765_v12 = vld [vmem:[#allocation5 + $0x2b4] sm:$0xf]  ;;  %v1576_v13 = vld [vmem:[#allocation5 + $0x2cc] sm:$0xf0]  ;;  %v1268_v49 = vld [vmem:[#allocation5 + $0x64] sm:$0xf0] }
  0x91   :  { %v1579_v19 = vor.u32 %v1765_v12, %v1576_v13  ;;  %v1271_v57 = vor.u32 %v1688_v48, %v1268_v49  ;;  %v1638_v12 = vld [vmem:[#allocation5 + $0x328] sm:$0xf]  ;;  %v1783_v13 = vld [vmem:[#allocation5 + $0x340] sm:$0xf0]  ;;  %v1246_v48 = vld [vmem:[#allocation5 + $0x18] sm:$0xf] }
  0x92   :  { %942 = vmatpush.bf16.msra.mxu0 %v1375_v23  ;;  %955 = vmatpush.bf16.msra.mxu1 %v1599_v27  ;;  %v85_v23 = vperm.slane %v82_v21, 1  ;;  %v1761_v21 = vld [vmem:[#allocation5 + $0x290] sm:$0xf0] }
  0x93   :  { %933 = vmatpush.bf16.msrb.mxu3 %v1483_v3  ;;  %v1685_v49 = vld [vmem:[#allocation5 + $0x30] sm:$0xf0] }
  0x96   :  { %943 = vmatpush.bf16.msra.mxu0 %v1347_v35  ;;  %956 = vmatpush.bf16.msra.mxu1 %v1571_v39 }
  0x97   :  { %934 = vmatpush.bf16.msrb.mxu3 %v1455_v14  ;;  %v1351_v14 = vor.u32 %v1712_v5, %v1350_v4 }
  0x9a   :  { %944 = vmatpush.bf16.msra.mxu0 %v1319_v47  ;;  %957 = vmatpush.bf16.msra.mxu1 %v1543_v51  ;;  %v1782_v47 = vld [vmem:[#allocation5 + $0x338] sm:$0xf0]  ;;  %v1632_v51 = vld [vmem:[#allocation5 + $0x33c] sm:$0xf0] }
  0x9b   :  { %v1631_v55 = vor.u32 %v1782_v47, %v1630_v46  ;;  %v1490_v46 = vld [vmem:[#allocation5 + $0x208] sm:$0xf]  ;;  %v1747_v47 = vld [vmem:[#allocation5 + $0x220] sm:$0xf0] }
  0x9e   :  { %945 = vmatpush.bf16.msra.mxu0 %v1291_v59  ;;  %958 = vmatpush.bf16.msra.mxu1 %v1515_v60  ;;  %v1635_v59 = vor.u32 %v1779_v50, %v1632_v51  ;;  %v1602_v60 = vld [vmem:[#allocation5 + $0x2e8] sm:$0xf]  ;;  %v1744_v50 = vld [vmem:[#allocation5 + $0x20c] sm:$0xf] }
  0x9f   :  { %v1603_v3 = vor.u32 %v1775_v61, %v1602_v60  ;;  %v1492_v51 = vld [vmem:[#allocation5 + $0x224] sm:$0xf0]  ;;  %v1681_v60 = vld [vmem:[#allocation5 + $0x14] sm:$0xf]  ;;  %v1240_v61 = vld [vmem:[#allocation5 + $0x2c] sm:$0xf0] }
  0xa2   :  { %946 = vmatpush.bf16.msra.mxu0 %v1263_v7  ;;  %959 = vmatpush.bf16.msra.mxu1 %v1487_v8  ;;  %v1607_v7 = vor.u32 %v1772_v0, %v1604_v1  ;;  %v1574_v8 = vld [vmem:[#allocation5 + $0x2b0] sm:$0xf]  ;;  %v1442_v0 = vld [vmem:[#allocation5 + $0x1a0] sm:$0xf]  ;;  %v1734_v1 = vld [vmem:[#allocation5 + $0x1b8] sm:$0xf0] }
  0xa3   :  { %v1575_v15 = vor.u32 %v1768_v9, %v1574_v8  ;;  %v1443_v8 = vor.u32 %v1734_v1, %v1442_v0 }
  0xa6   :  { %947 = vmatpush.bf16.msra.mxu0 %v1235_v18  ;;  %960 = vmatpush.bf16.msra.mxu1 %v1459_v20  ;;  %v1355_v18 = vor.u32 %v1709_v10, %v1352_v11  ;;  %v1546_v20 = vld [vmem:[#allocation5 + $0x278] sm:$0xf]  ;;  %v1414_v10 = vld [vmem:[#allocation5 + $0x168] sm:$0xf]  ;;  %v1727_v11 = vld [vmem:[#allocation5 + $0x180] sm:$0xf0] }
 0x106   :  { %v121_v24 = vpop.f32.mrf.mxu0  ;;  %v134_v25 = vpop.f32.mrf.mxu1 }
 0x107   :  { %v122_v26 = vadd.f32 %v121_v24, %v84_v22  ;;  %v135_v27 = vadd.f32 %v134_v25, %v85_v23  ;;  %v1702_v22 = vld [vmem:[#allocation5 + $0xbc] sm:$0xf]  ;;  %v1324_v23 = vld [vmem:[#allocation5 + $0xd4] sm:$0xf0] }
 0x108   :  { %v1758_v24 = vld [vmem:[#allocation5 + $0x27c] sm:$0xf]  ;;  %v1548_v25 = vld [vmem:[#allocation5 + $0x294] sm:$0xf0]  ;;  %v1327_v30 = vor.u32 %v1702_v22, %v1324_v23  ;;  %v1713_v23 = vld [vmem:[#allocation5 + $0x110] sm:$0xf0] }
 0x109   :  { %v138_v34 = vmax.f32 %v122_v26, 0.0  ;;  %v139_v35 = vmax.f32 %v135_v27, 0.0  ;;  %v1323_v26 = vor.u32 %v1705_v17, %v1322_v16  ;;  %v1547_v27 = vor.u32 %v1761_v21, %v1546_v20  ;;  %v1386_v16 = vld [vmem:[#allocation5 + $0x130] sm:$0xf]  ;;  %v1720_v17 = vld [vmem:[#allocation5 + $0x148] sm:$0xf0] }
 0x10a   :  { %v1551_v31 = vor.u32 %v1758_v24, %v1548_v25  ;;  %v1387_v20 = vor.u32 %v1720_v17, %v1386_v16  ;;  %v1358_v22 = vld [vmem:[#allocation5 + $0xf8] sm:$0xf]  ;;  %v1769_v25 = vld [vmem:[#allocation5 + $0x2d0] sm:$0xf0] }
 0x10b   :  { %v1976_v38 = vpack.c.bf16 %v138_v34, %v138_v34  ;;  %v1978_v39 = vpack.c.bf16 %v139_v35, %v139_v35  ;;  %v1695_v34 = vld [vmem:[#allocation5 + $0x84] sm:$0xf]  ;;  %v1296_v35 = vld [vmem:[#allocation5 + $0x9c] sm:$0xf0]  ;;  %v1582_v24 = vld [vmem:[#allocation5 + $0x2b8] sm:$0xf] }
 0x10d   :  { %870 = vmatmul.bf16.vlgmr.msra.gmra.mxu2 %v1976_v38  ;;  %883 = vmatmul.bf16.vlgmr.msra.gmra.mxu3 %v1978_v39 }
 0x10e   :  { %896 = vmatmul.bf16.vlgmr.msrb.gmra.mxu0 %v1976_v38  ;;  %909 = vmatmul.bf16.vlgmr.msrb.gmra.mxu1 %v1978_v39  ;;  %v123_v52 = vpop.f32.mrf.mxu0  ;;  %v136_v53 = vpop.f32.mrf.mxu1 }
 0x10f   :  { %966 = vmatpush.bf16.msra.mxu2 %v1435_v40  ;;  %979 = vmatpush.bf16.msra.mxu3 %v1659_v41  ;;  %v1295_v40 = vor.u32 %v1698_v29, %v1294_v28  ;;  %v1519_v41 = vor.u32 %v1754_v33, %v1518_v32  ;;  %v1267_v52 = vor.u32 %v1691_v43, %v1266_v42  ;;  %v1330_v28 = vld [vmem:[#allocation5 + $0xc0] sm:$0xf]  ;;  %v1706_v29 = vld [vmem:[#allocation5 + $0xd8] sm:$0xf0]  ;;  %v1274_v42 = vld [vmem:[#allocation5 + $0x50] sm:$0xf] }
 0x110   :  { %992 = vmatpush.bf16.msrb.mxu0 %v1439_v44  ;;  %1005 = vmatpush.bf16.msrb.mxu1 %v1663_v45  ;;  %v1299_v44 = vor.u32 %v1695_v34, %v1296_v35  ;;  %v1523_v45 = vor.u32 %v1751_v36, %v1520_v37  ;;  %v1491_v53 = vor.u32 %v1747_v47, %v1490_v46  ;;  %v1302_v34 = vld [vmem:[#allocation5 + $0x88] sm:$0xf]  ;;  %v1699_v35 = vld [vmem:[#allocation5 + $0xa0] sm:$0xf0]  ;;  %v1692_v43 = vld [vmem:[#allocation5 + $0x68] sm:$0xf0] }
 0x111   :  { %v1331_v32 = vor.u32 %v1706_v29, %v1330_v28  ;;  %v1526_v36 = vld [vmem:[#allocation5 + $0x248] sm:$0xf]  ;;  %v1755_v37 = vld [vmem:[#allocation5 + $0x260] sm:$0xf0]  ;;  %v1275_v46 = vor.u32 %v1692_v43, %v1274_v42 }
 0x113   :  { %967 = vmatpush.bf16.msra.mxu2 %v1407_v54  ;;  %980 = vmatpush.bf16.msra.mxu3 %v1631_v55  ;;  %v1238_v54 = vld [vmem:[#allocation5 + $0x10] sm:$0xf]  ;;  %v1684_v55 = vld [vmem:[#allocation5 + $0x28] sm:$0xf0] }
 0x114   :  { %993 = vmatpush.bf16.msrb.mxu0 %v1411_v58  ;;  %1006 = vmatpush.bf16.msrb.mxu1 %v1635_v59  ;;  %v1495_v58 = vor.u32 %v1744_v50, %v1492_v51  ;;  %v1740_v59 = vld [vmem:[#allocation5 + $0x1e8] sm:$0xf0]  ;;  %v1239_v4 = vor.u32 %v1684_v55, %v1238_v54  ;;  %v1470_v50 = vld [vmem:[#allocation5 + $0x1d8] sm:$0xf]  ;;  %v1741_v51 = vld [vmem:[#allocation5 + $0x1f0] sm:$0xf0] }
 0x115   :  { %v1463_v5 = vor.u32 %v1740_v59, %v1462_v56  ;;  %v1997_v54 = vld [vmem:[%s2015_s6] sm:$0xff]  ;;  %s1915_s6 = smov [#allocation7]  }
 0x116   :  { %v273_v55 = vperm.slane %v1997_v54, 1  ;;  %v272_v59 = vperm.slane %v1997_v54, 0  ;;  %s1189_s19 = sshll.u32 %s1915_s6, 4  ;;  %s1190_s19 = int_to_ptr.vmem [resolvable:$true] %s1189_s19 }
 0x117   :  { %968 = vmatpush.bf16.msra.mxu2 %v1379_v2  ;;  %981 = vmatpush.bf16.msra.mxu3 %v1603_v3  ;;  %v1666_v2 = vld [vmem:[#allocation5 + $0x360] sm:$0xf]  ;;  %v1790_v3 = vld [vmem:[#allocation5 + $0x378] sm:$0xf0] }
 0x118   :  { %994 = vmatpush.bf16.msrb.mxu0 %v1383_v6  ;;  %1007 = vmatpush.bf16.msrb.mxu1 %v1607_v7  ;;  %v1243_v6 = vor.u32 %v1681_v60, %v1240_v61  ;;  %v1467_v7 = vor.u32 %v1737_v62, %v1464_v63  ;;  %v1667_v9 = vor.u32 %v1790_v3, %v1666_v2 }
 0x11b   :  { %969 = vmatpush.bf16.msra.mxu2 %v1351_v14  ;;  %982 = vmatpush.bf16.msra.mxu3 %v1575_v15  ;;  %v1415_v14 = vor.u32 %v1727_v11, %v1414_v10  ;;  %v1639_v15 = vor.u32 %v1783_v13, %v1638_v12  ;;  %v274_v12 = vperm.slane %v1997_v54, 2 }
 0x11c   :  { %995 = vmatpush.bf16.msrb.mxu0 %v1355_v18  ;;  %1008 = vmatpush.bf16.msrb.mxu1 %v1579_v19  ;;  %v1610_v18 = vld [vmem:[#allocation5 + $0x2f0] sm:$0xf]  ;;  %v1776_v19 = vld [vmem:[#allocation5 + $0x308] sm:$0xf0] }
 0x11d   :  { %922 = vmatmul.bf16.vlgmr.msrb.gmra.mxu2 %v1976_v38  ;;  %935 = vmatmul.bf16.vlgmr.msrb.gmra.mxu3 %v1978_v39  ;;  %v1611_v21 = vor.u32 %v1776_v19, %v1610_v18 }
 0x11e   :  { %948 = vmatmul.bf16.vlgmr.msra.gmra.mxu0 %v1976_v38  ;;  %961 = vmatmul.bf16.vlgmr.msra.gmra.mxu1 %v1978_v39 }
 0x11f   :  { %970 = vmatpush.bf16.msra.mxu2 %v1323_v26  ;;  %983 = vmatpush.bf16.msra.mxu3 %v1547_v27  ;;  %v1359_v26 = vor.u32 %v1713_v23, %v1358_v22  ;;  %v1583_v27 = vor.u32 %v1769_v25, %v1582_v24 }
 0x120   :  { %996 = vmatpush.bf16.msrb.mxu0 %v1327_v30  ;;  %1009 = vmatpush.bf16.msrb.mxu1 %v1551_v31  ;;  %v1554_v30 = vld [vmem:[#allocation5 + $0x280] sm:$0xf]  ;;  %v1762_v31 = vld [vmem:[#allocation5 + $0x298] sm:$0xf0] }
 0x121   :  { %v1555_v33 = vor.u32 %v1762_v31, %v1554_v30 }
 0x123   :  { %971 = vmatpush.bf16.msra.mxu2 %v1295_v40  ;;  %984 = vmatpush.bf16.msra.mxu3 %v1519_v41  ;;  %v1303_v40 = vor.u32 %v1699_v35, %v1302_v34  ;;  %v1527_v41 = vor.u32 %v1755_v37, %v1526_v36  ;;  %v277_v37 = vperm.slane %v1997_v54, 5 }
 0x124   :  { %997 = vmatpush.bf16.msrb.mxu0 %v1299_v44  ;;  %1010 = vmatpush.bf16.msrb.mxu1 %v1523_v45  ;;  %v1498_v44 = vld [vmem:[#allocation5 + $0x210] sm:$0xf]  ;;  %v1748_v45 = vld [vmem:[#allocation5 + $0x228] sm:$0xf0] }
 0x125   :  { %v1499_v47 = vor.u32 %v1748_v45, %v1498_v44 }
 0x127   :  { %972 = vmatpush.bf16.msra.mxu2 %v1267_v52  ;;  %985 = vmatpush.bf16.msra.mxu3 %v1491_v53  ;;  %v1247_v52 = vor.u32 %v1685_v49, %v1246_v48  ;;  %v1471_v53 = vor.u32 %v1741_v51, %v1470_v50 }
 0x128   :  { %998 = vmatpush.bf16.msrb.mxu0 %v1271_v57  ;;  %1011 = vmatpush.bf16.msrb.mxu1 %v1495_v58 }
 0x12b   :  { %973 = vmatpush.bf16.msra.mxu2 %v1239_v4  ;;  %986 = vmatpush.bf16.msra.mxu3 %v1463_v5 }
 0x12c   :  { %999 = vmatpush.bf16.msrb.mxu0 %v1243_v6  ;;  %1012 = vmatpush.bf16.msrb.mxu1 %v1467_v7  ;;  %v275_v6 = vperm.slane %v1997_v54, 3 }
 0x12e   :  { %974 = vmatmul.bf16.vlgmr.msra.gmra.mxu2 %v1976_v38  ;;  %987 = vmatmul.bf16.vlgmr.msra.gmra.mxu3 %v1978_v39 }
 0x12f   :  { %1018 = vmatpush.bf16.msrb.mxu2 %v1443_v8  ;;  %1031 = vmatpush.bf16.msrb.mxu3 %v1667_v9 }
 0x130   :  { %1000 = vmatmul.bf16.vlgmr.msrb.gmra.mxu0 %v1976_v38  ;;  %1013 = vmatmul.bf16.vlgmr.msrb.gmra.mxu1 %v1978_v39 }
 0x133   :  { %1019 = vmatpush.bf16.msrb.mxu2 %v1415_v14  ;;  %1032 = vmatpush.bf16.msrb.mxu3 %v1639_v15 }
 0x137   :  { %1020 = vmatpush.bf16.msrb.mxu2 %v1387_v20  ;;  %1033 = vmatpush.bf16.msrb.mxu3 %v1611_v21 }
 0x13b   :  { %1021 = vmatpush.bf16.msrb.mxu2 %v1359_v26  ;;  %1034 = vmatpush.bf16.msrb.mxu3 %v1583_v27 }
 0x13f   :  { %1022 = vmatpush.bf16.msrb.mxu2 %v1331_v32  ;;  %1035 = vmatpush.bf16.msrb.mxu3 %v1555_v33 }
 0x143   :  { %1023 = vmatpush.bf16.msrb.mxu2 %v1303_v40  ;;  %1036 = vmatpush.bf16.msrb.mxu3 %v1527_v41 }
 0x147   :  { %1024 = vmatpush.bf16.msrb.mxu2 %v1275_v46  ;;  %1037 = vmatpush.bf16.msrb.mxu3 %v1499_v47 }
 0x14b   :  { %1025 = vmatpush.bf16.msrb.mxu2 %v1247_v52  ;;  %1038 = vmatpush.bf16.msrb.mxu3 %v1471_v53  ;;  %v276_v53 = vperm.slane %v1997_v54, 4 }
 0x14e   :  { %1026 = vmatmul.bf16.vlgmr.msrb.gmra.mxu2 %v1976_v38  ;;  %1039 = vmatmul.bf16.vlgmr.msrb.gmra.mxu3 %v1978_v39 }
 0x18b   :  { %v897_v56 = vpop.f32.mrf.mxu0  ;;  %v910_v57 = vpop.f32.mrf.mxu1 }
 0x18c   :  { %v898_v58 = vadd.f32 %v897_v56, %v273_v55 }
 0x18e   :  { %v911_v60 = vadd.f32 %v910_v57, %v898_v58 }
 0x190   :  { %v1669_v61 = vmul.f32 -1.442695, %v911_v60  ;;  %v871_v62 = vpop.f32.mrf.mxu2  ;;  %v884_v63 = vpop.f32.mrf.mxu3 }
 0x191   :  { %v872_v0 = vadd.f32 %v871_v62, %v272_v59 }
 0x192   :  { %1802 = vpow2.f32 %v1669_v61 }
 0x193   :  { %v885_v38 = vadd.f32 %v884_v63, %v872_v0  ;;  %v899_v39 = vpop.f32.mrf.mxu0  ;;  %v912_v1 = vpop.f32.mrf.mxu1 }
 0x195   :  { %v1668_v2 = vmul.f32 -1.442695, %v885_v38 }
 0x197   :  { %1804 = vpow2.f32 %v1668_v2 }
 0x198   :  { %v1803_v3 = vpop.eup %1802  ;;  %v873_v4 = vpop.f32.mrf.mxu2 }
 0x199   :  { %v886_v5 = vpop.f32.mrf.mxu3  ;;  %v1066_v7 = vadd.f32 1.0, %v1803_v3 }
 0x19b   :  { %1806 = vrcp.f32 %v1066_v7  ;;  %v949_v8 = vpop.f32.mrf.mxu0  ;;  %v962_v9 = vpop.f32.mrf.mxu1  ;;  %v1098_v25 = vand.u32 2147483648, %v1066_v7  ;;  %v1096_v29 = vand.u32 2147483647, %v1066_v7  ;;  %vm1092_vm2 = vweird.f32 %v1066_v7 }
 0x19c   :  { %v950_v10 = vadd.f32 %v949_v8, %v275_v6 }
 0x19d   :  { %v1805_v11 = vpop.eup %1804  ;;  %v1099_v35 = vor.u32 1.1754944e-38, %v1098_v25  ;;  %vm1097_vm4 = vcmp.eq.f32.partialorder %v1096_v29, 8.507059e+37 }
 0x19e   :  { %v1065_v13 = vadd.f32 1.0, %v1805_v11  ;;  %v963_v14 = vadd.f32 %v962_v9, %v950_v10 }
 0x1a0   :  { %1808 = vrcp.f32 %v1065_v13  ;;  %v923_v15 = vpop.f32.mrf.mxu2  ;;  %v1671_v18 = vmul.f32 -1.442695, %v963_v14  ;;  %v1083_v41 = vand.u32 2147483648, %v1065_v13  ;;  %v1081_v45 = vand.u32 2147483647, %v1065_v13 }
 0x1a1   :  { %v936_v16 = vpop.f32.mrf.mxu3  ;;  %v1807_v17 = vpop.eup %1806  ;;  %v924_v19 = vadd.f32 %v923_v15, %v274_v12  ;;  %vm1077_vm6 = vweird.f32 %v1065_v13 }
 0x1a2   :  { %v1088_v20 = vmul.f32 %v1807_v17, %v1066_v7  ;;  %1810 = vpow2.f32 %v1671_v18  ;;  %vm1093_vm1 = vweird.f32 %v1807_v17  ;;  %v1084_v51 = vor.u32 1.1754944e-38, %v1083_v41 }
 0x1a3   :  { %v937_v21 = vadd.f32 %v936_v16, %v924_v19  ;;  %v951_v22 = vpop.f32.mrf.mxu0  ;;  %v964_v23 = vpop.f32.mrf.mxu1  ;;  %vm1094_vm3 = vmor %vm1092_vm2, %vm1093_vm1  ;;  %vm1082_vm8 = vcmp.eq.f32.partialorder %v1081_v45, 8.507059e+37  ;;  %v278_v41 = vperm.slane %v1997_v54, 6 }
 0x1a4   :  { %v1089_v24 = vsub.f32 1.0, %v1088_v20 }
 0x1a5   :  { %v1670_v26 = vmul.f32 -1.442695, %v937_v21 }
 0x1a6   :  { %v1809_v27 = vpop.eup %1808  ;;  %v1090_v28 = vmul.f32 %v1807_v17, %v1089_v24 }
 0x1a7   :  { %v1073_v30 = vmul.f32 %v1809_v27, %v1065_v13  ;;  %1812 = vpow2.f32 %v1670_v26  ;;  %vm1078_vm5 = vweird.f32 %v1809_v27 }
 0x1a8   :  { %v1091_v31 = vadd.f32 %v1807_v17, %v1090_v28  ;;  %v925_v32 = vpop.f32.mrf.mxu2  ;;  %v1811_v34 = vpop.eup %1810  ;;  %vm1079_vm7 = vmor %vm1077_vm6, %vm1078_vm5 }
 0x1a9   :  { %v938_v33 = vpop.f32.mrf.mxu3  ;;  %v1074_v36 = vsub.f32 1.0, %v1073_v30  ;;  %v1068_v42 = vadd.f32 1.0, %v1811_v34 }
 0x1aa   :  { %v1095_v40 = vsel %vm1094_vm3, %v1807_v17, %v1091_v31 }
 0x1ab   :  { %v1100_v43 = vsel %vm1097_vm4, %v1099_v35, %v1095_v40  ;;  %v1075_v44 = vmul.f32 %v1809_v27, %v1074_v36  ;;  %1814 = vrcp.f32 %v1068_v42  ;;  %v1126_v3 = vand.u32 2147483647, %v1068_v42 }
 0x1ac   :  { %1178 = vst [vmem:[#allocation7 + $0x8] sm:$0xff] %v1100_v43  ;;  %v1128_v4 = vand.u32 2147483648, %v1068_v42  ;;  %vm1122_vm10 = vweird.f32 %v1068_v42 }
 0x1ad   :  { %v1001_v46 = vpop.f32.mrf.mxu0  ;;  %v1014_v47 = vpop.f32.mrf.mxu1  ;;  %v1076_v49 = vadd.f32 %v1809_v27, %v1075_v44  ;;  %vm1127_vm12 = vcmp.eq.f32.partialorder %v1126_v3, 8.507059e+37 }
 0x1ae   :  { %v1813_v48 = vpop.eup %1812  ;;  %v1002_v50 = vadd.f32 %v1001_v46, %v277_v37  ;;  %v1129_v13 = vor.u32 1.1754944e-38, %v1128_v4 }
 0x1af   :  { %v1067_v52 = vadd.f32 1.0, %v1813_v48  ;;  %v1080_v55 = vsel %vm1079_vm7, %v1809_v27, %v1076_v49 }
 0x1b0   :  { %v1015_v56 = vadd.f32 %v1014_v47, %v1002_v50  ;;  %v1085_v57 = vsel %vm1082_vm8, %v1084_v51, %v1080_v55 }
 0x1b1   :  { %1816 = vrcp.f32 %v1067_v52  ;;  %1177 = vst [vmem:[#allocation7] sm:$0xff] %v1085_v57  ;;  %v975_v59 = vpop.f32.mrf.mxu2  ;;  %v988_v60 = vpop.f32.mrf.mxu3  ;;  %v1113_v14 = vand.u32 2147483648, %v1067_v52  ;;  %v1111_v18 = vand.u32 2147483647, %v1067_v52  ;;  %vm1107_vm14 = vweird.f32 %v1067_v52 }
 0x1b2   :  { %v1673_v58 = vmul.f32 -1.442695, %v1015_v56  ;;  %v1815_v61 = vpop.eup %1814  ;;  %v976_v62 = vadd.f32 %v975_v59, %v276_v53 }
 0x1b3   :  { %v1118_v63 = vmul.f32 %v1815_v61, %v1068_v42  ;;  %vm1123_vm9 = vweird.f32 %v1815_v61  ;;  %v1114_v22 = vor.u32 1.1754944e-38, %v1113_v14  ;;  %vm1112_vm0 = vcmp.eq.f32.partialorder %v1111_v18, 8.507059e+37 }
 0x1b4   :  { %1818 = vpow2.f32 %v1673_v58  ;;  %v989_v0 = vadd.f32 %v988_v60, %v976_v62  ;;  %vm1124_vm11 = vmor %vm1122_vm10, %vm1123_vm9 }
 0x1b5   :  { %v1003_v38 = vpop.f32.mrf.mxu0  ;;  %v1016_v39 = vpop.f32.mrf.mxu1  ;;  %v1119_v1 = vsub.f32 1.0, %v1118_v63 }
 0x1b6   :  { %v1672_v5 = vmul.f32 -1.442695, %v989_v0 }
 0x1b7   :  { %v1817_v2 = vpop.eup %1816  ;;  %v1120_v6 = vmul.f32 %v1815_v61, %v1119_v1 }
 0x1b8   :  { %v1103_v7 = vmul.f32 %v1817_v2, %v1067_v52  ;;  %1820 = vpow2.f32 %v1672_v5  ;;  %vm1108_vm13 = vweird.f32 %v1817_v2 }
 0x1b9   :  { %v1121_v9 = vadd.f32 %v1815_v61, %v1120_v6  ;;  %v977_v11 = vpop.f32.mrf.mxu2  ;;  %v990_v12 = vpop.f32.mrf.mxu3  ;;  %vm1109_vm15 = vmor %vm1107_vm14, %vm1108_vm13 }
 0x1ba   :  { %v1819_v8 = vpop.eup %1818  ;;  %v1104_v10 = vsub.f32 1.0, %v1103_v7 }
 0x1bb   :  { %v1070_v15 = vadd.f32 1.0, %v1819_v8  ;;  %v1125_v16 = vsel %vm1124_vm11, %v1815_v61, %v1121_v9 }
 0x1bc   :  { %v1105_v17 = vmul.f32 %v1817_v2, %v1104_v10  ;;  %v1130_v19 = vsel %vm1127_vm12, %v1129_v13, %v1125_v16 }
 0x1bd   :  { %1822 = vrcp.f32 %v1070_v15  ;;  %1180 = vst [vmem:[#allocation7 + $0x18] sm:$0xff] %v1130_v19  ;;  %v1158_v29 = vand.u32 2147483648, %v1070_v15  ;;  %v1156_v32 = vand.u32 2147483647, %v1070_v15  ;;  %vm1152_vm2 = vweird.f32 %v1070_v15 }
 0x1be   :  { %v1106_v20 = vadd.f32 %v1817_v2, %v1105_v17  ;;  %v1821_v21 = vpop.eup %1820 }
 0x1bf   :  { %v1069_v24 = vadd.f32 1.0, %v1821_v21  ;;  %v1159_v35 = vor.u32 1.1754944e-38, %v1158_v29  ;;  %vm1157_vm4 = vcmp.eq.f32.partialorder %v1156_v32, 8.507059e+37 }
 0x1c0   :  { %v1110_v23 = vsel %vm1109_vm15, %v1817_v2, %v1106_v20 }
 0x1c1   :  { %v1115_v25 = vsel %vm1112_vm0, %v1114_v22, %v1110_v23  ;;  %1824 = vrcp.f32 %v1069_v24  ;;  %v1143_v40 = vand.u32 2147483648, %v1069_v24  ;;  %v1141_v44 = vand.u32 2147483647, %v1069_v24 }
 0x1c2   :  { %1179 = vst [vmem:[#allocation7 + $0x10] sm:$0xff] %v1115_v25  ;;  %vm1137_vm6 = vweird.f32 %v1069_v24 }
 0x1c3   :  { %v1823_v26 = vpop.eup %1822  ;;  %v1144_v46 = vor.u32 1.1754944e-38, %v1143_v40  ;;  %vm1142_vm8 = vcmp.eq.f32.partialorder %v1141_v44, 8.507059e+37 }
 0x1c4   :  { %v1148_v27 = vmul.f32 %v1823_v26, %v1070_v15  ;;  %vm1153_vm1 = vweird.f32 %v1823_v26 }
 0x1c5   :  { %vm1154_vm3 = vmor %vm1152_vm2, %vm1153_vm1 }
 0x1c6   :  { %v1149_v28 = vsub.f32 1.0, %v1148_v27 }
 0x1c7   :  { %v1825_v30 = vpop.eup %1824 }
 0x1c8   :  { %v1150_v31 = vmul.f32 %v1823_v26, %v1149_v28  ;;  %v1133_v33 = vmul.f32 %v1825_v30, %v1069_v24  ;;  %vm1138_vm5 = vweird.f32 %v1825_v30 }
 0x1c9   :  { %vm1139_vm7 = vmor %vm1137_vm6, %vm1138_vm5 }
 0x1ca   :  { %v1151_v34 = vadd.f32 %v1823_v26, %v1150_v31  ;;  %v1134_v36 = vsub.f32 1.0, %v1133_v33 }
 0x1cc   :  { %v1155_v37 = vsel %vm1154_vm3, %v1823_v26, %v1151_v34  ;;  %v1135_v43 = vmul.f32 %v1825_v30, %v1134_v36 }
 0x1cd   :  { %v1160_v42 = vsel %vm1157_vm4, %v1159_v35, %v1155_v37 }
 0x1ce   :  { %1182 = vst [vmem:[#allocation7 + $0x28] sm:$0xff] %v1160_v42  ;;  %v1136_v45 = vadd.f32 %v1825_v30, %v1135_v43 }
 0x1d0   :  { %v1140_v49 = vsel %vm1139_vm7, %v1825_v30, %v1136_v45 }
 0x1d1   :  { %v1027_v47 = vpop.f32.mrf.mxu2  ;;  %v1040_v48 = vpop.f32.mrf.mxu3  ;;  %v1145_v51 = vsel %vm1142_vm8, %v1144_v46, %v1140_v49 }
 0x1d2   :  { %v1028_v50 = vadd.f32 %v1027_v47, %v278_v41  ;;  %1181 = vst [vmem:[#allocation7 + $0x20] sm:$0xff] %v1145_v51 }
 0x1d4   :  { %v1041_v52 = vadd.f32 %v1040_v48, %v1028_v50 }
 0x1d6   :  { %v1674_v53 = vmul.f32 -1.442695, %v1041_v52 }
 0x1d8   :  { %1826 = vpow2.f32 %v1674_v53 }
 0x1d9   :  { %v1029_v54 = vpop.f32.mrf.mxu2  ;;  %v1042_v55 = vpop.f32.mrf.mxu3 }
 0x1de   :  { %v1827_v56 = vpop.eup %1826 }
 0x1df   :  { %v1071_v57 = vadd.f32 1.0, %v1827_v56 }
 0x1e1   :  { %1828 = vrcp.f32 %v1071_v57  ;;  %v1173_v61 = vand.u32 2147483648, %v1071_v57  ;;  %v1171_v63 = vand.u32 2147483647, %v1071_v57  ;;  %vm1167_vm10 = vweird.f32 %v1071_v57 }
 0x1e3   :  { %v1174_v38 = vor.u32 1.1754944e-38, %v1173_v61  ;;  %vm1172_vm12 = vcmp.eq.f32.partialorder %v1171_v63, 8.507059e+37 }
 0x1e7   :  { %v1829_v58 = vpop.eup %1828 }
 0x1e8   :  { %v1163_v59 = vmul.f32 %v1829_v58, %v1071_v57  ;;  %vm1168_vm9 = vweird.f32 %v1829_v58 }
 0x1e9   :  { %vm1169_vm11 = vmor %vm1167_vm10, %vm1168_vm9 }
 0x1ea   :  { %v1164_v60 = vsub.f32 1.0, %v1163_v59 }
 0x1ec   :  { %v1165_v62 = vmul.f32 %v1829_v58, %v1164_v60 }
 0x1ee   :  { %v1166_v0 = vadd.f32 %v1829_v58, %v1165_v62 }
 0x1f0   :  { %v1170_v39 = vsel %vm1169_vm11, %v1829_v58, %v1166_v0 }
 0x1f1   :  { %v1175_v1 = vsel %vm1172_vm12, %v1174_v38, %v1170_v39 }
 0x1f2   :  { %1183 = vst [vmem:[#allocation7 + $0x30] sm:$0xff] %v1175_v1 }
 0x1f3   :  { %1194 = dma.vmem_to_hbm [thread:$0]  %s1190_s19, 896, %s1192_s22, [#allocation4]  }
 0x1f4   :  { %1906 = dma.done.wait [#allocation4], 896  }
 0x1f5   :  { %1907 = vsyncadd [#allocation4], 4294966400 }
 0x1f6   :  { %1199 = vsyncpa [#allocation3], 1 }
 0x1f7   :  { %1200 = vsyncpa [#allocation6], 1 }
 0x1f8   :  { %1201 = vsyncpa [#allocation4], 1 }

</bundles_post_ra>
